<compile_context>
chip_gen: v7x
topology: tpu7x:2x2x1
jax: 0.10.0
libtpu: 0.0.40
codegen_flags: <defaults>
</compile_context>

<pallas_src>
import jax
import jax.numpy as jnp
from jax.experimental import pallas as pl
from jax.experimental.pallas import tpu as pltpu


# ---------------------------------------------------------------------------
# helpers
# ---------------------------------------------------------------------------
def _round_up(x, m):
    return ((x + m - 1) // m) * m


def _pad2(a, rows, cols):
    return jnp.pad(a, ((0, rows - a.shape[0]), (0, cols - a.shape[1])))


_COMPILER_PARAMS = pltpu.CompilerParams(
    dimension_semantics=("parallel", "arbitrary"),   # row tiles parallel (megacore), k reduction arbitrary
    vmem_limit_bytes=32 * 1024 * 1024,
)


# ---------------------------------------------------------------------------
# Kernel 1: conv1 (mean-aggr + lin_l + lin_r + bias) + ReLU, fused with the
#           layer-2 left projection P = h @ W2_l (re-association for layer 2).
# Grid: (num_row_tiles, num_adj_col_tiles); axis 1 (k) is the reduction axis.
# Weight / bias / row-tile blocks have k-invariant index maps, so Pallas only
# DMAs them when the row tile changes (no redundant fetch across k).
# ---------------------------------------------------------------------------
def _layer1_kernel(x_col_ref, x_row_ref, adj_ref, w1l_ref, w1r_ref, b1_ref,
                   w2l_ref, h_ref, p_ref, acc_ref):
    k = pl.program_id(1)

    @pl.when(k == 0)
    def _():
        acc_ref[...] = jnp.zeros_like(acc_ref)

    # mean aggregation: partial A[i,k] @ X[k]   (bf16 inputs, f32 accumulation on the MXU)
    acc_ref[...] += jnp.dot(adj_ref[...], x_col_ref[...],
                            preferred_element_type=jnp.float32)

    @pl.when(k == pl.num_programs(1) - 1)
    def _():
        aggr = acc_ref[...].astype(jnp.bfloat16)
        h = (jnp.dot(aggr, w1l_ref[...], preferred_element_type=jnp.float32)
             + jnp.dot(x_row_ref[...], w1r_ref[...], preferred_element_type=jnp.float32)
             + b1_ref[...])                          # bias add in f32
        h = jnp.maximum(h, 0.0)                      # ReLU in f32 (VPU)
        hb = h.astype(jnp.bfloat16)
        h_ref[...] = hb                              # lane-dense store (hp % 128 == 0)
        # layer-2 re-association: project once per row tile so layer 2 only does A @ P
        p_ref[...] = jnp.dot(hb, w2l_ref[...],
                             preferred_element_type=jnp.float32).astype(jnp.bfloat16)


def _layer1_call(x_p, adj_p, w1l, w1r, b1, w2l, *, tile):
    np_, dp = x_p.shape
    hp = w1l.shape[1]
    op = w2l.shape[1]
    grid = (np_ // tile, np_ // tile)
    return pl.pallas_call(
        _layer1_kernel,
        out_shape=(jax.ShapeDtypeStruct((np_, hp), jnp.bfloat16),
                   jax.ShapeDtypeStruct((np_, op), jnp.bfloat16)),
        grid=grid,
        in_specs=[
            pl.BlockSpec((tile, dp), lambda i, k: (k, 0)),     # x, column tile (aggregation)
            pl.BlockSpec((tile, dp), lambda i, k: (i, 0)),     # x, row tile (self term)
            pl.BlockSpec((tile, tile), lambda i, k: (i, k)),   # adjacency tile
            pl.BlockSpec((dp, hp), lambda i, k: (0, 0)),       # W1_l
            pl.BlockSpec((dp, hp), lambda i, k: (0, 0)),       # W1_r
            pl.BlockSpec((1, hp), lambda i, k: (0, 0)),        # b1 (f32)
            pl.BlockSpec((hp, op), lambda i, k: (0, 0)),       # W2_l
        ],
        out_specs=(
            pl.BlockSpec((tile, hp), lambda i, k: (i, 0)),     # h  (bf16)
            pl.BlockSpec((tile, op), lambda i, k: (i, 0)),     # P = h @ W2_l (bf16)
        ),
        scratch_shapes=[pltpu.VMEM((tile, dp), jnp.float32)],
        compiler_params=_COMPILER_PARAMS,
    )(x_p, x_p, adj_p, w1l, w1r, b1, w2l)


# ---------------------------------------------------------------------------
# Kernel 2: conv2 = A @ P + h @ W2_r + b2  (P precomputed by kernel 1)
# ---------------------------------------------------------------------------
def _layer2_kernel(p_col_ref, adj_ref, h_row_ref, w2r_ref, b2_ref, o_ref, acc_ref):
    k = pl.program_id(1)

    @pl.when(k == 0)
    def _():
        acc_ref[...] = jnp.zeros_like(acc_ref)

    acc_ref[...] += jnp.dot(adj_ref[...], p_col_ref[...],
                            preferred_element_type=jnp.float32)

    @pl.when(k == pl.num_programs(1) - 1)
    def _():
        out = (acc_ref[...]
               + jnp.dot(h_row_ref[...], w2r_ref[...], preferred_element_type=jnp.float32)
               + b2_ref[...])
        o_ref[...] = out.astype(o_ref.dtype)


def _layer2_call(p, adj_p, h, w2r, b2, *, tile):
    np_, op = p.shape
    hp = h.shape[1]
    grid = (np_ // tile, np_ // tile)
    return pl.pallas_call(
        _layer2_kernel,
        out_shape=jax.ShapeDtypeStruct((np_, op), jnp.float32),
        grid=grid,
        in_specs=[
            pl.BlockSpec((tile, op), lambda i, k: (k, 0)),     # P, column tile (aggregation)
            pl.BlockSpec((tile, tile), lambda i, k: (i, k)),   # adjacency tile
            pl.BlockSpec((tile, hp), lambda i, k: (i, 0)),     # h, row tile (self term)
            pl.BlockSpec((hp, op), lambda i, k: (0, 0)),       # W2_r
            pl.BlockSpec((1, op), lambda i, k: (0, 0)),        # b2 (f32)
        ],
        out_specs=pl.BlockSpec((tile, op), lambda i, k: (i, 0)),
        scratch_shapes=[pltpu.VMEM((tile, op), jnp.float32)],
        compiler_params=_COMPILER_PARAMS,
    )(p, adj_p, h, w2r, b2)


# ---------------------------------------------------------------------------
# Glue: edge_index -> row-normalized dense adjacency (mean aggregation matrix)
# ---------------------------------------------------------------------------
def build_mean_adj(edge_index, num_nodes):
    src = edge_index[0]
    dst = edge_index[1]
    adj = jnp.zeros((num_nodes, num_nodes), jnp.float32).at[dst, src].add(1.0)
    deg = adj.sum(axis=1, keepdims=True)
    return adj / jnp.maximum(deg, 1.0)     # isolated nodes -> zero row (PyG mean semantics)


# ---------------------------------------------------------------------------
# Parameters (shapes dictated by SAGEConv(in, out): lin_l has bias, lin_r doesn't)
# ---------------------------------------------------------------------------
def init_params(key, in_dim, hid_dim, out_dim):
    ks = jax.random.split(key, 4)

    def glorot(k, fan_in, fan_out):
        lim = (6.0 / (fan_in + fan_out)) ** 0.5
        return jax.random.uniform(k, (fan_in, fan_out), jnp.float32, -lim, lim)

    return {
        "w1_l": glorot(ks[0], in_dim, hid_dim),
        "w1_r": glorot(ks[1], in_dim, hid_dim),
        "b1": jnp.zeros((1, hid_dim), jnp.float32),
        "w2_l": glorot(ks[2], hid_dim, out_dim),
        "w2_r": glorot(ks[3], hid_dim, out_dim),
        "b2": jnp.zeros((1, out_dim), jnp.float32),
    }


# ---------------------------------------------------------------------------
# Full Net.forward (dropout with training=False is the identity -> nothing emitted)
# ---------------------------------------------------------------------------
def net_forward(params, x, edge_index, *, tile=256):
    n, din = x.shape
    hid = params["w1_l"].shape[1]
    dout = params["w2_l"].shape[1]

    # Adaptive tile: don't over-pad tiny graphs, keep (8,128)-aligned blocks.
    tile = max(128, min(tile, _round_up(n, 128)))

    adj = build_mean_adj(edge_index, n)

    np_ = _round_up(n, tile)            # node padding (zero rows/cols: exact)
    dp = _round_up(din, 128)            # lane-dense feature padding
    hp = _round_up(hid, 128)
    op = _round_up(dout, 128)

    x_p = _pad2(x, np_, dp).astype(jnp.bfloat16)
    adj_p = _pad2(adj, np_, np_).astype(jnp.bfloat16)
    w1l = _pad2(params["w1_l"], dp, hp).astype(jnp.bfloat16)
    w1r = _pad2(params["w1_r"], dp, hp).astype(jnp.bfloat16)
    b1 = _pad2(params["b1"], 1, hp)                       # f32
    w2l = _pad2(params["w2_l"], hp, op).astype(jnp.bfloat16)
    w2r = _pad2(params["w2_r"], hp, op).astype(jnp.bfloat16)
    b2 = _pad2(params["b2"], 1, op)                       # f32

    h, p = _layer1_call(x_p, adj_p, w1l, w1r, b1, w2l, tile=tile)
    out_p = _layer2_call(p, adj_p, h, w2r, b2, tile=tile)
    return out_p[:n, :dout]


# ---------------------------------------------------------------------------
# Pure-JAX reference (mirrors the kernel's bf16 input / intermediate rounding)
# ---------------------------------------------------------------------------
def net_forward_ref(params, x, edge_index):
    def bf(a):
        return a.astype(jnp.bfloat16).astype(jnp.float32)

    adj = build_mean_adj(edge_index, x.shape[0])
    xb, ab = bf(x), bf(adj)
    w1l, w1r = bf(params["w1_l"]), bf(params["w1_r"])
    w2l, w2r = bf(params["w2_l"]), bf(params["w2_r"])

    aggr1 = bf(ab @ xb)
    h = jnp.maximum(aggr1 @ w1l + xb @ w1r + params["b1"], 0.0)
    hb = bf(h)
    pmat = bf(hb @ w2l)
    return ab @ pmat + hb @ w2r + params["b2"]


if __name__ == "__main__":
    N, E = 200, 800               # nodes, edges
    IN_DIM, HID_DIM, OUT_DIM = 8, 32, 8

    key = jax.random.PRNGKey(0)
    k_x, k_src, k_dst, k_p = jax.random.split(key, 4)

    x = jax.random.normal(k_x, (N, IN_DIM), jnp.float32)
    edge_index = jnp.stack(
        [
            jax.random.randint(k_src, (E,), 0, N),
            jax.random.randint(k_dst, (E,), 0, N),
        ],
        axis=0,
    ).astype(jnp.int32)           # shape (2, E), like PyG edge_index

    params = init_params(k_p, IN_DIM, HID_DIM, OUT_DIM)

    out = net_forward(params, x, edge_index)
    out = jax.block_until_ready(out)

    ref = net_forward_ref(params, x, edge_index)
    assert out.shape == (N, OUT_DIM)
    assert jnp.allclose(out, ref, atol=1e-2, rtol=1e-2), float(jnp.max(jnp.abs(out - ref)))

    print("KERNEL_OK")
</pallas_src>

<mosaic_0001>
module attributes {stable_mosaic.version = 11 : i64} {
  func.func @_layer1_kernel(%arg0: i32, %arg1: i32, %arg2: memref<256x128xbf16, #tpu.memory_space<vmem>>, %arg3: memref<256x128xbf16, #tpu.memory_space<vmem>>, %arg4: memref<256x256xbf16, #tpu.memory_space<vmem>>, %arg5: memref<128x128xbf16, #tpu.memory_space<vmem>>, %arg6: memref<128x128xbf16, #tpu.memory_space<vmem>>, %arg7: memref<1x128xf32, #tpu.memory_space<vmem>>, %arg8: memref<128x128xbf16, #tpu.memory_space<vmem>>, %arg9: memref<256x128xbf16, #tpu.memory_space<vmem>>, %arg10: memref<256x128xbf16, #tpu.memory_space<vmem>>, %arg11: memref<256x128xf32, #tpu.memory_space<vmem>>) attributes {dimension_semantics = [#tpu.dimension_semantics<parallel>, #tpu.dimension_semantics<arbitrary>], iteration_bounds = array<i64: 1, 1>, scalar_prefetch = 0 : i64, scratch_operands = 1 : i64, tpu.core_type = #tpu.core_type<tc>, window_params = [{transform_indices = @transform_0, window_bounds = array<i64: 256, 128>}, {transform_indices = @transform_1, window_bounds = array<i64: 256, 128>}, {transform_indices = @transform_2, window_bounds = array<i64: 256, 256>}, {pipeline_mode = #tpu.pipeline_mode<synchronous>, transform_indices = @transform_3, window_bounds = array<i64: 128, 128>}, {pipeline_mode = #tpu.pipeline_mode<synchronous>, transform_indices = @transform_4, window_bounds = array<i64: 128, 128>}, {pipeline_mode = #tpu.pipeline_mode<synchronous>, transform_indices = @transform_5, window_bounds = array<i64: 1, 128>}, {pipeline_mode = #tpu.pipeline_mode<synchronous>, transform_indices = @transform_6, window_bounds = array<i64: 128, 128>}, {transform_indices = @transform_7, window_bounds = array<i64: 256, 128>}, {transform_indices = @transform_8, window_bounds = array<i64: 256, 128>}]} {
    %c0_i32 = arith.constant 0 : i32
    %0 = arith.cmpi eq, %arg1, %c0_i32 : i32
    %1 = arith.extui %0 : i1 to i32
    %c0_i32_0 = arith.constant 0 : i32
    %2 = arith.cmpi ne, %1, %c0_i32_0 : i32
    scf.if %2 {
      %cst_10 = arith.constant 0.000000e+00 : f32
      %12 = vector.broadcast %cst_10 : f32 to vector<256x128xf32>
      %c0_11 = arith.constant 0 : index
      %c0_12 = arith.constant 0 : index
      %13 = vector.load %arg11[%c0_11, %c0_12] : memref<256x128xf32, #tpu.memory_space<vmem>>, vector<256x128xf32>
      tpu.vector_store %arg11[%c0_11, %c0_12], %12 {strides = array<i32>} : memref<256x128xf32, #tpu.memory_space<vmem>>, vector<256x128xf32>,
    } else {
    }
    %c0 = arith.constant 0 : index
    %c0_1 = arith.constant 0 : index
    %3 = vector.load %arg11[%c0, %c0_1] : memref<256x128xf32, #tpu.memory_space<vmem>>, vector<256x128xf32>
    %c0_2 = arith.constant 0 : index
    %c0_3 = arith.constant 0 : index
    %4 = vector.load %arg4[%c0_2, %c0_3] : memref<256x256xbf16, #tpu.memory_space<vmem>>, vector<256x256xbf16>
    %c0_4 = arith.constant 0 : index
    %c0_5 = arith.constant 0 : index
    %5 = vector.load %arg2[%c0_4, %c0_5] : memref<256x128xbf16, #tpu.memory_space<vmem>>, vector<256x128xbf16>
    %cst = arith.constant dense<0.000000e+00> : vector<256x128xf32>
    %6 = tpu.matmul %4, %5, %cst {dimension_numbers = #tpu.dot_dimension_numbers<[1], [0], [0], [1], [0, 0, 1, 1], [], []>} : vector<256x256xbf16>, vector<256x128xbf16>, vector<256x128xf32> -> vector<256x128xf32>
    %7 = arith.addf %3, %6 : vector<256x128xf32>
    %c0_6 = arith.constant 0 : index
    %c0_7 = arith.constant 0 : index
    %8 = vector.load %arg11[%c0_6, %c0_7] : memref<256x128xf32, #tpu.memory_space<vmem>>, vector<256x128xf32>
    tpu.vector_store %arg11[%c0_6, %c0_7], %7 {strides = array<i32>} : memref<256x128xf32, #tpu.memory_space<vmem>>, vector<256x128xf32>,
    %c0_i32_8 = arith.constant 0 : i32
    %9 = arith.cmpi eq, %arg1, %c0_i32_8 : i32
    %10 = arith.extui %9 : i1 to i32
    %c0_i32_9 = arith.constant 0 : i32
    %11 = arith.cmpi ne, %10, %c0_i32_9 : i32
    scf.if %11 {
      %c0_10 = arith.constant 0 : index
      %c0_11 = arith.constant 0 : index
      %12 = vector.load %arg11[%c0_10, %c0_11] : memref<256x128xf32, #tpu.memory_space<vmem>>, vector<256x128xf32>
      %13 = arith.truncf %12 : vector<256x128xf32> to vector<256x128xbf16>
      %c0_12 = arith.constant 0 : index
      %c0_13 = arith.constant 0 : index
      %14 = vector.load %arg5[%c0_12, %c0_13] : memref<128x128xbf16, #tpu.memory_space<vmem>>, vector<128x128xbf16>
      %cst_14 = arith.constant dense<0.000000e+00> : vector<256x128xf32>
      %15 = tpu.matmul %13, %14, %cst_14 {dimension_numbers = #tpu.dot_dimension_numbers<[1], [0], [0], [1], [0, 0, 1, 1], [], []>} : vector<256x128xbf16>, vector<128x128xbf16>, vector<256x128xf32> -> vector<256x128xf32>
      %c0_15 = arith.constant 0 : index
      %c0_16 = arith.constant 0 : index
      %16 = vector.load %arg3[%c0_15, %c0_16] : memref<256x128xbf16, #tpu.memory_space<vmem>>, vector<256x128xbf16>
      %c0_17 = arith.constant 0 : index
      %c0_18 = arith.constant 0 : index
      %17 = vector.load %arg6[%c0_17, %c0_18] : memref<128x128xbf16, #tpu.memory_space<vmem>>, vector<128x128xbf16>
      %cst_19 = arith.constant dense<0.000000e+00> : vector<256x128xf32>
      %18 = tpu.matmul %16, %17, %cst_19 {dimension_numbers = #tpu.dot_dimension_numbers<[1], [0], [0], [1], [0, 0, 1, 1], [], []>} : vector<256x128xbf16>, vector<128x128xbf16>, vector<256x128xf32> -> vector<256x128xf32>
      %19 = arith.addf %15, %18 : vector<256x128xf32>
      %c0_20 = arith.constant 0 : index
      %c0_21 = arith.constant 0 : index
      %20 = vector.load %arg7[%c0_20, %c0_21] : memref<1x128xf32, #tpu.memory_space<vmem>>, vector<1x128xf32>
      %21 = vector.broadcast %20 : vector<1x128xf32> to vector<256x128xf32>
      %22 = arith.addf %19, %21 : vector<256x128xf32>
      %cst_22 = arith.constant 0.000000e+00 : f32
      %23 = vector.broadcast %cst_22 : f32 to vector<256x128xf32>
      %24 = arith.maximumf %22, %23 : vector<256x128xf32>
      %25 = arith.truncf %24 : vector<256x128xf32> to vector<256x128xbf16>
      %c0_23 = arith.constant 0 : index
      %c0_24 = arith.constant 0 : index
      %26 = vector.load %arg9[%c0_23, %c0_24] : memref<256x128xbf16, #tpu.memory_space<vmem>>, vector<256x128xbf16>
      tpu.vector_store %arg9[%c0_23, %c0_24], %25 {strides = array<i32>} : memref<256x128xbf16, #tpu.memory_space<vmem>>, vector<256x128xbf16>,
      %c0_25 = arith.constant 0 : index
      %c0_26 = arith.constant 0 : index
      %27 = vector.load %arg8[%c0_25, %c0_26] : memref<128x128xbf16, #tpu.memory_space<vmem>>, vector<128x128xbf16>
      %cst_27 = arith.constant dense<0.000000e+00> : vector<256x128xf32>
      %28 = tpu.matmul %25, %27, %cst_27 {dimension_numbers = #tpu.dot_dimension_numbers<[1], [0], [0], [1], [0, 0, 1, 1], [], []>} : vector<256x128xbf16>, vector<128x128xbf16>, vector<256x128xf32> -> vector<256x128xf32>
      %29 = arith.truncf %28 : vector<256x128xf32> to vector<256x128xbf16>
      %c0_28 = arith.constant 0 : index
      %c0_29 = arith.constant 0 : index
      %30 = vector.load %arg10[%c0_28, %c0_29] : memref<256x128xbf16, #tpu.memory_space<vmem>>, vector<256x128xbf16>
      tpu.vector_store %arg10[%c0_28, %c0_29], %29 {strides = array<i32>} : memref<256x128xbf16, #tpu.memory_space<vmem>>, vector<256x128xbf16>,
    } else {
    }
    return
  }
  func.func @transform_0(%arg0: i32, %arg1: i32) -> (i32, i32) {
    %c0_i32 = arith.constant 0 : i32
    %c0_i32_0 = arith.constant 0 : i32
    return %arg1, %c0_i32 : i32, i32
  }
  func.func @transform_1(%arg0: i32, %arg1: i32) -> (i32, i32) {
    %c0_i32 = arith.constant 0 : i32
    %c0_i32_0 = arith.constant 0 : i32
    return %arg0, %c0_i32 : i32, i32
  }
  func.func @transform_2(%arg0: i32, %arg1: i32) -> (i32, i32) {
    %c0_i32 = arith.constant 0 : i32
    return %arg0, %arg1 : i32, i32
  }
  func.func @transform_3(%arg0: i32, %arg1: i32) -> (i32, i32) {
    %c0_i32 = arith.constant 0 : i32
    %c0_i32_0 = arith.constant 0 : i32
    %c0_i32_1 = arith.constant 0 : i32
    return %c0_i32, %c0_i32_0 : i32, i32
  }
  func.func @transform_4(%arg0: i32, %arg1: i32) -> (i32, i32) {
    %c0_i32 = arith.constant 0 : i32
    %c0_i32_0 = arith.constant 0 : i32
    %c0_i32_1 = arith.constant 0 : i32
    return %c0_i32, %c0_i32_0 : i32, i32
  }
  func.func @transform_5(%arg0: i32, %arg1: i32) -> (i32, i32) {
    %c0_i32 = arith.constant 0 : i32
    %c0_i32_0 = arith.constant 0 : i32
    %c0_i32_1 = arith.constant 0 : i32
    return %c0_i32, %c0_i32_0 : i32, i32
  }
  func.func @transform_6(%arg0: i32, %arg1: i32) -> (i32, i32) {
    %c0_i32 = arith.constant 0 : i32
    %c0_i32_0 = arith.constant 0 : i32
    %c0_i32_1 = arith.constant 0 : i32
    return %c0_i32, %c0_i32_0 : i32, i32
  }
  func.func @transform_7(%arg0: i32, %arg1: i32) -> (i32, i32) {
    %c0_i32 = arith.constant 0 : i32
    %c0_i32_0 = arith.constant 0 : i32
    return %arg0, %c0_i32 : i32, i32
  }
  func.func @transform_8(%arg0: i32, %arg1: i32) -> (i32, i32) {
    %c0_i32 = arith.constant 0 : i32
    %c0_i32_0 = arith.constant 0 : i32
    return %arg0, %c0_i32 : i32, i32
  }
}

</mosaic_0001>

<bundles_post_ra>
// kernel: tpu_custom_call.1
= control target key start
LH: loop header
LB: loop body
LE: loop exit
PB: predicated region body
PF: predicated region fallthrough
CT: control target
= control target key end

     0   :  { %14 = vsyncpa [#allocation4], 0  ;;  %s3362_s0 = inlined_call_operand.hbm [shape: bf16[256,128], index: 0, kind: input, shape index: {}]   ;;  %s3363_s1 = inlined_call_operand.hbm [shape: bf16[256,128], index: 1, kind: input, shape index: {}]   ;;  %s3364_s2 = inlined_call_operand.hbm [shape: bf16[256,256], index: 2, kind: input, shape index: {}]   ;;  %s3365_s3 = inlined_call_operand.hbm [shape: bf16[128,128], index: 3, kind: input, shape index: {}]   ;;  %s3366_s4 = inlined_call_operand.hbm [shape: bf16[128,128], index: 4, kind: input, shape index: {}]   ;;  %s3367_s5 = inlined_call_operand.vmem [shape: f32[1,128], index: 5, kind: input, shape index: {}]   ;;  %s3368_s6 = inlined_call_operand.hbm [shape: bf16[128,128], index: 6, kind: input, shape index: {}]   ;;  %s3369_s7 = inlined_call_operand.hbm [shape: bf16[256,128], index: 7, kind: output, shape index: {0}]   ;;  %s3370_s8 = inlined_call_operand.hbm [shape: bf16[256,128], index: 8, kind: output, shape index: {1}]  }
   0x1   :  { %15 = vsyncpa [#allocation7], 0 }
   0x2   :  { %16 = vsyncpa [#allocation10], 0 }
   0x3   :  { %17 = vsyncpa [#allocation13], 0 }
   0x4   :  { %18 = vsyncpa [#allocation5], 0 }
   0x5   :  { %19 = vsyncpa [#allocation16], 0  ;;  %s3094_s27 = smov [#allocation6]   ;;  %s3095_s29 = smov [#allocation9]  }
   0x6   :  { %s37_s28 = sshll.u32 %s3094_s27, 4  ;;  %s61_s30 = sshll.u32 %s3095_s29, 4  ;;  %s38_s28 = int_to_ptr.vmem [resolvable:$true] %s37_s28  ;;  %s3151_s30 = int_to_ptr.vmem [resolvable:$true] %s61_s30 }
   0x7   :  { %s2906_s11 = scalar_lea.hbm %s3363_s1, 2048 }
   0x8   :  { %p2907_p0 = scmp.ne.s32.totalorder %s3363_s1, %s2906_s11  ;;  %p2910_p1 = scmp.lt.u32.totalorder %s2906_s11, %s3363_s1 }
   0xa   :  { %p2912_p2 = pnand %p2910_p1, %p2907_p0 }
   0xc   :  { %2915 = shalt.err (!%p2912_p2)
}
   0xd   :  { %s2916_s16 = scalar_lea.vmem %s38_s28, 2048  ;;  %p2921_p4 = scmp.lt.s32.totalorder %s38_s28, %s38_s28 }
   0xe   :  { %p2917_p3 = scmp.ne.s32.totalorder %s38_s28, %s2916_s16  ;;  %p2922_p5 = scmp.lt.s32.totalorder %s2916_s16, %s2916_s16 }
  0x10   :  { %p2923_p6 = por %p2922_p5, %p2921_p4 }
  0x12   :  { %p2924_p7 = pnand %p2923_p6, %p2917_p3 }
  0x14   :  { %2927 = shalt.err (!%p2924_p7)
}
  0x15   :  { %s3096_s17 = smov 64   ;;  %s3097_s18 = smov 4  }
  0x16   :  { %43 = dma.hbm_to_vmem [thread:$0]  %s3363_s1, 2048, %s38_s28, [#allocation7], %s3096_s17, %s3096_s17, %s3097_s18  }
  0x17   :  { %s2928_s23 = scalar_lea.hbm %s3365_s3, 1024 }
  0x18   :  { %p2929_p8 = scmp.ne.s32.totalorder %s3365_s3, %s2928_s23  ;;  %p2932_p9 = scmp.lt.u32.totalorder %s2928_s23, %s3365_s3 }
  0x1a   :  { %p2934_p10 = pnand %p2932_p9, %p2929_p8 }
  0x1c   :  { %2937 = shalt.err (!%p2934_p10)
}
  0x1d   :  { %s2938_s29 = scalar_lea.vmem %s3151_s30, 1024  ;;  %p2943_p12 = scmp.lt.s32.totalorder %s3151_s30, %s3151_s30 }
  0x1e   :  { %p2939_p11 = scmp.ne.s32.totalorder %s3151_s30, %s2938_s29  ;;  %p2944_p13 = scmp.lt.s32.totalorder %s2938_s29, %s2938_s29 }
  0x20   :  { %p2945_p0 = por %p2944_p13, %p2943_p12 }
  0x22   :  { %p2946_p1 = pnand %p2945_p0, %p2939_p11 }
  0x24   :  { %2949 = shalt.err (!%p2946_p1)
}
  0x25   :  { %67 = dma.hbm_to_vmem [thread:$0]  %s3365_s3, 1024, %s3151_s30, [#allocation10], %s3096_s17, %s3096_s17, %s3097_s18  }
  0x26   :  { %s3098_s9 = smov [#allocation3]   ;;  %s3099_s11 = smov [#allocation8]  }
  0x27   :  { %s25_s10 = sshll.u32 %s3098_s9, 4  ;;  %s49_s12 = sshll.u32 %s3099_s11, 4  ;;  %s26_s10 = int_to_ptr.vmem [resolvable:$true] %s25_s10  ;;  %s3188_s12 = int_to_ptr.vmem [resolvable:$true] %s49_s12 }
  0x28   :  { %s2950_s15 = scalar_lea.hbm %s3362_s0, 2048 }
  0x29   :  { %p2951_p2 = scmp.ne.s32.totalorder %s3362_s0, %s2950_s15  ;;  %p2954_p3 = scmp.lt.u32.totalorder %s2950_s15, %s3362_s0 }
  0x2b   :  { %p2956_p4 = pnand %p2954_p3, %p2951_p2 }
  0x2d   :  { %2959 = shalt.err (!%p2956_p4)
}
  0x2e   :  { %s2960_s3 = scalar_lea.vmem %s26_s10, 2048  ;;  %p2965_p6 = scmp.lt.s32.totalorder %s26_s10, %s26_s10 }
  0x2f   :  { %p2961_p5 = scmp.ne.s32.totalorder %s26_s10, %s2960_s3  ;;  %p2966_p7 = scmp.lt.s32.totalorder %s2960_s3, %s2960_s3 }
  0x31   :  { %p2967_p8 = por %p2966_p7, %p2965_p6 }
  0x33   :  { %p2968_p9 = pnand %p2967_p8, %p2961_p5 }
  0x35   :  { %2971 = shalt.err (!%p2968_p9)
}
  0x36   :  { %31 = dma.hbm_to_vmem [thread:$0]  %s3362_s0, 2048, %s26_s10, [#allocation4], %s3096_s17, %s3096_s17, %s3097_s18  }
  0x37   :  { %s2972_s25 = scalar_lea.hbm %s3364_s2, 4096 }
  0x38   :  { %p2973_p10 = scmp.ne.s32.totalorder %s3364_s2, %s2972_s25  ;;  %p2976_p11 = scmp.lt.u32.totalorder %s2972_s25, %s3364_s2 }
  0x3a   :  { %p2978_p12 = pnand %p2976_p11, %p2973_p10 }
  0x3c   :  { %2981 = shalt.err (!%p2978_p12)
}
  0x3d   :  { %s2982_s28 = scalar_lea.vmem %s3188_s12, 4096  ;;  %p2987_p0 = scmp.lt.s32.totalorder %s3188_s12, %s3188_s12 }
  0x3e   :  { %p2983_p13 = scmp.ne.s32.totalorder %s3188_s12, %s2982_s28  ;;  %p2988_p1 = scmp.lt.s32.totalorder %s2982_s28, %s2982_s28 }
  0x40   :  { %p2989_p2 = por %p2988_p1, %p2987_p0 }
  0x42   :  { %p2990_p3 = pnand %p2989_p2, %p2983_p13 }
  0x44   :  { %2993 = shalt.err (!%p2990_p3)
}
  0x45   :  { %s3100_s0 = smov 128   ;;  %s3101_s9 = smov 8  }
  0x46   :  { %55 = dma.hbm_to_vmem [thread:$0]  %s3364_s2, 4096, %s3188_s12, [#allocation7], %s3100_s0, %s3100_s0, %s3101_s9  }
  0x47   :  { %s3102_s13 = smov [#allocation11]   ;;  %s3103_s15 = smov [#allocation12]  }
  0x48   :  { %s73_s14 = sshll.u32 %s3102_s13, 4  ;;  %s87_s16 = sshll.u32 %s3103_s15, 4  ;;  %s74_s14 = int_to_ptr.vmem [resolvable:$true] %s73_s14  ;;  %s3222_s16 = int_to_ptr.vmem [resolvable:$true] %s87_s16 }
  0x49   :  { %s2994_s21 = scalar_lea.hbm %s3366_s4, 1024 }
  0x4a   :  { %p2995_p4 = scmp.ne.s32.totalorder %s3366_s4, %s2994_s21  ;;  %p2998_p5 = scmp.lt.u32.totalorder %s2994_s21, %s3366_s4 }
  0x4c   :  { %p3000_p6 = pnand %p2998_p5, %p2995_p4 }
  0x4e   :  { %3003 = shalt.err (!%p3000_p6)
}
  0x4f   :  { %s3004_s2 = scalar_lea.vmem %s74_s14, 1024  ;;  %p3009_p8 = scmp.lt.s32.totalorder %s74_s14, %s74_s14 }
  0x50   :  { %p3005_p7 = scmp.ne.s32.totalorder %s74_s14, %s3004_s2  ;;  %p3010_p9 = scmp.lt.s32.totalorder %s3004_s2, %s3004_s2 }
  0x52   :  { %p3011_p10 = por %p3010_p9, %p3009_p8 }
  0x54   :  { %p3012_p11 = pnand %p3011_p10, %p3005_p7 }
  0x56   :  { %3015 = shalt.err (!%p3012_p11)
}
  0x57   :  { %79 = dma.hbm_to_vmem [thread:$0]  %s3366_s4, 1024, %s74_s14, [#allocation10], %s3096_s17, %s3096_s17, %s3097_s18  }
  0x58   :  { %s3016_s27 = scalar_lea.hbm %s3368_s6, 1024 }
  0x59   :  { %p3017_p12 = scmp.ne.s32.totalorder %s3368_s6, %s3016_s27  ;;  %p3020_p13 = scmp.lt.u32.totalorder %s3016_s27, %s3368_s6 }
  0x5b   :  { %p3022_p0 = pnand %p3020_p13, %p3017_p12 }
  0x5d   :  { %3025 = shalt.err (!%p3022_p0)
}
  0x5e   :  { %s3026_s9 = scalar_lea.vmem %s3222_s16, 1024  ;;  %p3031_p2 = scmp.lt.s32.totalorder %s3222_s16, %s3222_s16 }
  0x5f   :  { %p3027_p1 = scmp.ne.s32.totalorder %s3222_s16, %s3026_s9  ;;  %p3032_p3 = scmp.lt.s32.totalorder %s3026_s9, %s3026_s9 }
  0x61   :  { %p3033_p4 = por %p3032_p3, %p3031_p2 }
  0x63   :  { %p3034_p5 = pnand %p3033_p4, %p3027_p1 }
  0x65   :  { %3037 = shalt.err (!%p3034_p5)
}
  0x66   :  { %93 = dma.hbm_to_vmem [thread:$0]  %s3368_s6, 1024, %s3222_s16, [#allocation13], %s3096_s17, %s3096_s17, %s3097_s18  }
  0x67   :  { %3082 = dma.done.wait [#allocation4], 2048  }
  0x68   :  { %3083 = vsyncadd [#allocation4], 4294965248 }
  0x69   :  { %3084 = dma.done.wait [#allocation7], 6144  }
  0x6a   :  { %3085 = vsyncadd [#allocation7], 4294961152 }
  0x6b   :  { %3086 = dma.done.wait [#allocation10], 2048  }
  0x6c   :  { %3087 = vsyncadd [#allocation10], 4294965248 }
  0x6d   :  { %3088 = dma.done.wait [#allocation13], 1024  }
  0x6e   :  { %3089 = vsyncadd [#allocation13], 4294966272  ;;  %v2802_v0 = vld [vmem:[#allocation3 + $0x40] sm:$0xff]   ;;  %v2804_v2 = vld [vmem:[#allocation3 + $0x48] sm:$0xff]  }
  0x6f   :  { %v2803_v1 = vld [vmem:[#allocation3] sm:$0xff]   ;;  %2414 = vmatprep.subr.bf16.mxu0 %v2802_v0  ;;  %2742 = vmatprep.subr.bf16.mxu1 %v2802_v0  ;;  %v2805_v3 = vld [vmem:[#allocation3 + $0x8] sm:$0xff]   ;;  %v2806_v4 = vld [vmem:[#allocation3 + $0x50] sm:$0xff]  }
  0x70   :  { %2415 = vmatpush3.bf16.msra.mxu0 %v2803_v1  ;;  %2750 = vmatpush3.bf16.msra.mxu1 %v2803_v1  ;;  %v2807_v5 = vld [vmem:[#allocation3 + $0x10] sm:$0xff]   ;;  %v2808_v6 = vld [vmem:[#allocation3 + $0x58] sm:$0xff]   ;;  %v2810_v8 = vld [vmem:[#allocation3 + $0x60] sm:$0xff]  }
  0x71   :  { %2416 = vmatprep.subr.bf16.mxu0 %v2804_v2  ;;  %2743 = vmatprep.subr.bf16.mxu1 %v2804_v2  ;;  %v2809_v7 = vld [vmem:[#allocation3 + $0x18] sm:$0xff]   ;;  %v2811_v9 = vld [vmem:[#allocation3 + $0x20] sm:$0xff]   ;;  %v2812_v10 = vld [vmem:[#allocation3 + $0x68] sm:$0xff]  }
  0x72   :  { %v2820_v11 = vld [vmem:[#allocation8 + $0x4] ss:$8 sps:$4 sm:$0xff]   ;;  %v2814_v13 = vld [vmem:[#allocation3 + $0x70] sm:$0xff]   ;;  %v2816_v15 = vld [vmem:[#allocation3 + $0x78] sm:$0xff]  }
  0x73   :  { %v2813_v12 = vld [vmem:[#allocation3 + $0x28] sm:$0xff]   ;;  %533 = vmatprep.mubr.bf16.mxu0 %v2820_v11  ;;  %v2815_v14 = vld [vmem:[#allocation3 + $0x30] sm:$0xff]   ;;  %v2817_v16 = vld [vmem:[#allocation3 + $0x38] sm:$0xff]  }
  0x74   :  { %2417 = vmatpush3.bf16.msra.mxu0 %v2805_v3  ;;  %2751 = vmatpush3.bf16.msra.mxu1 %v2805_v3  ;;  %v2818_v17 = vld [vmem:[#allocation8] ss:$8 sps:$4 sm:$0xff]   ;;  %v2850_v18 = vld [vmem:[#allocation8 + $0xc4] ss:$8 sps:$4 sm:$0xff]   ;;  %v2821_v19 = vld [vmem:[#allocation8 + $0x14] ss:$8 sps:$4 sm:$0xff]  }
  0x75   :  { %2418 = vmatprep.subr.bf16.mxu0 %v2806_v4  ;;  %2744 = vmatprep.subr.bf16.mxu1 %v2806_v4  ;;  %v2848_v20 = vld [vmem:[#allocation8 + $0xc0] ss:$8 sps:$4 sm:$0xff]   ;;  %v2854_v21 = vld [vmem:[#allocation8 + $0xd4] ss:$8 sps:$4 sm:$0xff]   ;;  %v2823_v22 = vld [vmem:[#allocation8 + $0x10] ss:$8 sps:$4 sm:$0xff]  }
  0x76   :  { %629 = vmatprep.mubr.bf16.mxu1 %v2850_v18  ;;  %v2824_v23 = vld [vmem:[#allocation8 + $0x24] ss:$8 sps:$4 sm:$0xff]   ;;  %v2856_v24 = vld [vmem:[#allocation8 + $0xd0] ss:$8 sps:$4 sm:$0xff]   ;;  %v2826_v29 = vld [vmem:[#allocation8 + $0x20] ss:$8 sps:$4 sm:$0xff]  }
  0x77   :  { %v2866_v25 = vld [vmem:[#allocation11] sm:$0xff]   ;;  %v2867_v26 = vld [vmem:[#allocation11 + $0x8] sm:$0xff]   ;;  %v2868_v28 = vld [vmem:[#allocation11 + $0x10] sm:$0xff]  }
  0x78   :  { %2419 = vmatpush3.bf16.msra.mxu0 %v2807_v5  ;;  %2752 = vmatpush3.bf16.msra.mxu1 %v2807_v5  ;;  %v2860_v27 = vld [vmem:[#allocation8 + $0xe4] ss:$8 sps:$4 sm:$0xff]   ;;  %v2827_v30 = vld [vmem:[#allocation8 + $0x34] ss:$8 sps:$4 sm:$0xff]   ;;  %v2862_v32 = vld [vmem:[#allocation8 + $0xe0] ss:$8 sps:$4 sm:$0xff]  }
  0x79   :  { %2420 = vmatprep.subr.bf16.mxu0 %v2808_v6  ;;  %2745 = vmatprep.subr.bf16.mxu1 %v2808_v6  ;;  %v2869_v31 = vld [vmem:[#allocation11 + $0x18] sm:$0xff]   ;;  %v2870_v34 = vld [vmem:[#allocation11 + $0x20] sm:$0xff]   ;;  %v2871_v37 = vld [vmem:[#allocation11 + $0x28] sm:$0xff]  }
  0x7a   :  { %v2863_v33 = vld [vmem:[#allocation8 + $0xf4] ss:$8 sps:$4 sm:$0xff]   ;;  %v2829_v35 = vld [vmem:[#allocation8 + $0x30] ss:$8 sps:$4 sm:$0xff]   ;;  %v2830_v36 = vld [vmem:[#allocation8 + $0x44] ss:$8 sps:$4 sm:$0xff]  }
  0x7b   :  { %v2865_v38 = vld [vmem:[#allocation8 + $0xf0] ss:$8 sps:$4 sm:$0xff]   ;;  %v2874_v39 = vld [vmem:[#allocation6] sm:$0xff]   ;;  %v2833_v43 = vld [vmem:[#allocation8 + $0x54] ss:$8 sps:$4 sm:$0xff]  }
  0x7c   :  { %2421 = vmatpush3.bf16.msra.mxu0 %v2809_v7  ;;  %2753 = vmatpush3.bf16.msra.mxu1 %v2809_v7  ;;  %v2872_v40 = vld [vmem:[#allocation11 + $0x30] sm:$0xff]   ;;  %v2832_v41 = vld [vmem:[#allocation8 + $0x40] ss:$8 sps:$4 sm:$0xff]   ;;  %v2873_v42 = vld [vmem:[#allocation11 + $0x38] sm:$0xff]  }
  0x7d   :  { %2422 = vmatprep.subr.bf16.mxu0 %v2810_v8  ;;  %2746 = vmatprep.subr.bf16.mxu1 %v2810_v8  ;;  %v2884_v44 = vld [vmem:[#allocation9] sm:$0xff]   ;;  %v2875_v45 = vld [vmem:[#allocation6 + $0x8] sm:$0xff]   ;;  %v2876_v46 = vld [vmem:[#allocation6 + $0x10] sm:$0xff]  }
  0x7e   :  { %v2835_v47 = vld [vmem:[#allocation8 + $0x50] ss:$8 sps:$4 sm:$0xff]   ;;  %v2885_v48 = vld [vmem:[#allocation9 + $0x8] sm:$0xff]   ;;  %v2878_v52 = vld [vmem:[#allocation6 + $0x20] sm:$0xff]  }
  0x7f   :  { %v2836_v49 = vld [vmem:[#allocation8 + $0x64] ss:$8 sps:$4 sm:$0xff]   ;;  %v2888_v50 = vld [vmem:[#allocation9 + $0x10] sm:$0xff]   ;;  %v2877_v51 = vld [vmem:[#allocation6 + $0x18] sm:$0xff]  }
  0x80   :  { %2423 = vmatpush3.bf16.msra.mxu0 %v2811_v9  ;;  %2754 = vmatpush3.bf16.msra.mxu1 %v2811_v9  ;;  %v2838_v53 = vld [vmem:[#allocation8 + $0x60] ss:$8 sps:$4 sm:$0xff]   ;;  %v2889_v54 = vld [vmem:[#allocation9 + $0x18] sm:$0xff]   ;;  %v2880_v57 = vld [vmem:[#allocation6 + $0x30] sm:$0xff]  }
  0x81   :  { %2424 = vmatprep.subr.bf16.mxu0 %v2812_v10  ;;  %2747 = vmatprep.subr.bf16.mxu1 %v2812_v10  ;;  %v2839_v55 = vld [vmem:[#allocation8 + $0x74] ss:$8 sps:$4 sm:$0xff]   ;;  %v2879_v56 = vld [vmem:[#allocation6 + $0x28] sm:$0xff]   ;;  %v2841_v58 = vld [vmem:[#allocation8 + $0x70] ss:$8 sps:$4 sm:$0xff]  }
  0x82   :  { %v2842_v59 = vld [vmem:[#allocation8 + $0x84] ss:$8 sps:$4 sm:$0xff]   ;;  %v2881_v60 = vld [vmem:[#allocation6 + $0x38] sm:$0xff]   ;;  %v2844_v62 = vld [vmem:[#allocation8 + $0x80] ss:$8 sps:$4 sm:$0xff]  }
  0x83   :  { %v2882_v61 = vld [vmem:[#allocation6 + $0x40] sm:$0xff]   ;;  %v2845_v63 = vld [vmem:[#allocation8 + $0x94] ss:$8 sps:$4 sm:$0xff]   ;;  %v2883_v0 = vld [vmem:[#allocation6 + $0x48] sm:$0xff]  }
  0x84   :  { %2425 = vmatpush3.bf16.msra.mxu0 %v2813_v12  ;;  %2755 = vmatpush3.bf16.msra.mxu1 %v2813_v12  ;;  %v2886_v1 = vld [vmem:[#allocation6 + $0x50] sm:$0xff]   ;;  %v2851_v3 = vld [vmem:[#allocation8 + $0xa4] ss:$8 sps:$4 sm:$0xff]   ;;  %v2887_v4 = vld [vmem:[#allocation6 + $0x58] sm:$0xff]  }
  0x85   :  { %2426 = vmatprep.subr.bf16.mxu0 %v2814_v13  ;;  %2748 = vmatprep.subr.bf16.mxu1 %v2814_v13  ;;  %v2847_v2 = vld [vmem:[#allocation8 + $0x90] ss:$8 sps:$4 sm:$0xff]   ;;  %v2890_v5 = vld [vmem:[#allocation6 + $0x60] sm:$0xff]   ;;  %v2857_v7 = vld [vmem:[#allocation8 + $0xb4] ss:$8 sps:$4 sm:$0xff]  }
  0x86   :  { %v2853_v6 = vld [vmem:[#allocation8 + $0xa0] ss:$8 sps:$4 sm:$0xff]   ;;  %v2859_v10 = vld [vmem:[#allocation8 + $0xb0] ss:$8 sps:$4 sm:$0xff]  }
  0x87   :  { %v2892_v8 = vld [vmem:[#allocation9 + $0x20] sm:$0xff]   ;;  %v2891_v9 = vld [vmem:[#allocation6 + $0x68] sm:$0xff]   ;;  %v2894_v12 = vld [vmem:[#allocation6 + $0x70] sm:$0xff]  }
  0x88   :  { %2427 = vmatpush3.bf16.msra.mxu0 %v2815_v14  ;;  %2756 = vmatpush3.bf16.msra.mxu1 %v2815_v14  ;;  %v2893_v11 = vld [vmem:[#allocation9 + $0x28] sm:$0xff]   ;;  %v2896_v13 = vld [vmem:[#allocation9 + $0x30] sm:$0xff]   ;;  %v2895_v14 = vld [vmem:[#allocation6 + $0x78] sm:$0xff]  }
  0x89   :  { %2428 = vmatprep.subr.bf16.mxu0 %v2816_v15  ;;  %2749 = vmatprep.subr.bf16.mxu1 %v2816_v15  ;;  %v2897_v15 = vld [vmem:[#allocation9 + $0x38] sm:$0xff]   ;;  %v2900_v18 = vld [vmem:[#allocation12 + $0x10] sm:$0xff]  }
  0x8c   :  { %2429 = vmatpush3.bf16.msra.mxu0 %v2817_v16  ;;  %2757 = vmatpush3.bf16.msra.mxu1 %v2817_v16  ;;  %v2898_v16 = vld [vmem:[#allocation12] sm:$0xff]  }
  0x8d   :  { %2598 = vmatprep.subr.bf16.mxu1 %v2866_v25  ;;  %2694 = vmatprep.subr.bf16.mxu0 %v2898_v16 }
  0x8f   :  { %534 = vmatmul.mubr.bf16.vlgmr.msra.gmra.mrb[0].mxu0 %v2818_v17  ;;  %630 = vmatmul.mubr.bf16.vlgmr.msra.gmra.mrb[0].mxu1 %v2848_v20  ;;  %v2899_v17 = vld [vmem:[#allocation12 + $0x8] sm:$0xff]   ;;  %v2902_v20 = vld [vmem:[#allocation12 + $0x20] sm:$0xff]  }
  0x90   :  { %541 = vmatprep.mubr.bf16.mxu0 %v2821_v19  ;;  %637 = vmatprep.mubr.bf16.mxu1 %v2854_v21  ;;  %v2901_v19 = vld [vmem:[#allocation12 + $0x18] sm:$0xff]  }
  0x91   :  { %2599 = vmatpush3.bf16.msra.mxu1 %v2866_v25  ;;  %2695 = vmatpush3.bf16.msra.mxu0 %v2898_v16 }
  0x92   :  { %2600 = vmatprep.subr.bf16.mxu1 %v2867_v26  ;;  %2696 = vmatprep.subr.bf16.mxu0 %v2899_v17 }
  0x95   :  { %2601 = vmatpush3.bf16.msra.mxu1 %v2867_v26  ;;  %2697 = vmatpush3.bf16.msra.mxu0 %v2899_v17 }
  0x96   :  { %2602 = vmatprep.subr.bf16.mxu1 %v2868_v28  ;;  %2698 = vmatprep.subr.bf16.mxu0 %v2900_v18 }
  0x97   :  { %542 = vmatmul.mubr.bf16.gmra.mrb[4].mxu0 %v2823_v22  ;;  %638 = vmatmul.mubr.bf16.gmra.mrb[4].mxu1 %v2856_v24  ;;  %v2903_v22 = vld [vmem:[#allocation12 + $0x28] sm:$0xff]  }
  0x98   :  { %549 = vmatprep.mubr.bf16.mxu0 %v2824_v23  ;;  %645 = vmatprep.mubr.bf16.mxu1 %v2860_v27 }
  0x99   :  { %2603 = vmatpush3.bf16.msra.mxu1 %v2868_v28  ;;  %2699 = vmatpush3.bf16.msra.mxu0 %v2900_v18 }
  0x9a   :  { %2604 = vmatprep.subr.bf16.mxu1 %v2869_v31  ;;  %2700 = vmatprep.subr.bf16.mxu0 %v2901_v19 }
  0x9d   :  { %2605 = vmatpush3.bf16.msra.mxu1 %v2869_v31  ;;  %2701 = vmatpush3.bf16.msra.mxu0 %v2901_v19 }
  0x9e   :  { %2606 = vmatprep.subr.bf16.mxu1 %v2870_v34  ;;  %2702 = vmatprep.subr.bf16.mxu0 %v2902_v20 }
  0x9f   :  { %550 = vmatmul.mubr.bf16.gmra.mrb[8].mxu0 %v2826_v29  ;;  %646 = vmatmul.mubr.bf16.gmra.mrb[8].mxu1 %v2862_v32 }
  0xa0   :  { %557 = vmatprep.mubr.bf16.mxu0 %v2827_v30  ;;  %653 = vmatprep.mubr.bf16.mxu1 %v2863_v33 }
  0xa1   :  { %2607 = vmatpush3.bf16.msra.mxu1 %v2870_v34  ;;  %2703 = vmatpush3.bf16.msra.mxu0 %v2902_v20 }
  0xa2   :  { %2608 = vmatprep.subr.bf16.mxu1 %v2871_v37  ;;  %2704 = vmatprep.subr.bf16.mxu0 %v2903_v22 }
  0xa5   :  { %2609 = vmatpush3.bf16.msra.mxu1 %v2871_v37  ;;  %2705 = vmatpush3.bf16.msra.mxu0 %v2903_v22 }
  0xa6   :  { %2610 = vmatprep.subr.bf16.mxu1 %v2872_v40 }
  0xa7   :  { %558 = vmatmul.mubr.bf16.gmra.mrb[12].mxu0 %v2829_v35  ;;  %654 = vmatmul.mubr.bf16.gmra.mrb[12].mxu1 %v2865_v38 }
  0xa8   :  { %565 = vmatprep.mubr.bf16.mxu0 %v2830_v36  ;;  %2614 = vmatprep.mubr.bf16.mxu1 %v2874_v39 }
  0xa9   :  { %2611 = vmatpush3.bf16.msra.mxu1 %v2872_v40 }
  0xaa   :  { %2612 = vmatprep.subr.bf16.mxu1 %v2873_v42 }
  0xad   :  { %2613 = vmatpush3.bf16.msra.mxu1 %v2873_v42 }
  0xae   :  { %2646 = vmatprep.subr.bf16.mxu1 %v2884_v44 }
  0xaf   :  { %566 = vmatmul.mubr.bf16.gmra.mrb[16].mxu0 %v2832_v41 }
  0xb0   :  { %573 = vmatprep.mubr.bf16.mxu0 %v2833_v43  ;;  %2615 = vmatmul.mubr.bf16.vlgmr.msra.gmra.mrb[16].mxu1 %v2875_v45 }
  0xb1   :  { %2618 = vmatprep.mubr.bf16.mxu1 %v2876_v46  ;;  %2647 = vmatpush3.bf16.msra.mxu1 %v2884_v44 }
  0xb2   :  { %2648 = vmatprep.subr.bf16.mxu1 %v2885_v48 }
  0xb5   :  { %2649 = vmatpush3.bf16.msra.mxu1 %v2885_v48 }
  0xb6   :  { %2650 = vmatprep.subr.bf16.mxu1 %v2888_v50 }
  0xb7   :  { %574 = vmatmul.mubr.bf16.gmra.mrb[20].mxu0 %v2835_v47 }
  0xb8   :  { %581 = vmatprep.mubr.bf16.mxu0 %v2836_v49  ;;  %2619 = vmatmul.mubr.bf16.gmra.mrb[20].mxu1 %v2877_v51 }
  0xb9   :  { %2622 = vmatprep.mubr.bf16.mxu1 %v2878_v52  ;;  %2651 = vmatpush3.bf16.msra.mxu1 %v2888_v50 }
  0xba   :  { %2652 = vmatprep.subr.bf16.mxu1 %v2889_v54 }
  0xbd   :  { %2653 = vmatpush3.bf16.msra.mxu1 %v2889_v54 }
  0xbe   :  { %2654 = vmatprep.subr.bf16.mxu1 %v2892_v8 }
  0xbf   :  { %582 = vmatmul.mubr.bf16.gmra.mrb[24].mxu0 %v2838_v53 }
  0xc0   :  { %589 = vmatprep.mubr.bf16.mxu0 %v2839_v55  ;;  %2623 = vmatmul.mubr.bf16.gmra.mrb[24].mxu1 %v2879_v56 }
  0xc1   :  { %2626 = vmatprep.mubr.bf16.mxu1 %v2880_v57  ;;  %2655 = vmatpush3.bf16.msra.mxu1 %v2892_v8 }
  0xc2   :  { %2656 = vmatprep.subr.bf16.mxu1 %v2893_v11 }
  0xc5   :  { %2657 = vmatpush3.bf16.msra.mxu1 %v2893_v11 }
  0xc6   :  { %2658 = vmatprep.subr.bf16.mxu1 %v2896_v13 }
  0xc7   :  { %590 = vmatmul.mubr.bf16.gmra.mrb[28].mxu0 %v2841_v58 }
  0xc8   :  { %597 = vmatprep.mubr.bf16.mxu0 %v2842_v59  ;;  %2627 = vmatmul.mubr.bf16.gmra.mrb[28].mxu1 %v2881_v60 }
  0xc9   :  { %2630 = vmatprep.mubr.bf16.mxu1 %v2882_v61  ;;  %2659 = vmatpush3.bf16.msra.mxu1 %v2896_v13 }
  0xca   :  { %2660 = vmatprep.subr.bf16.mxu1 %v2897_v15 }
  0xcd   :  { %2661 = vmatpush3.bf16.msra.mxu1 %v2897_v15 }
  0xcf   :  { %598 = vmatmul.mubr.bf16.gmra.mrb[32].mxu0 %v2844_v62 }
  0xd0   :  { %605 = vmatprep.mubr.bf16.mxu0 %v2845_v63  ;;  %2631 = vmatmul.mubr.bf16.gmra.mrb[32].mxu1 %v2883_v0 }
  0xd1   :  { %2634 = vmatprep.mubr.bf16.mxu1 %v2886_v1 }
  0xd7   :  { %606 = vmatmul.mubr.bf16.gmra.mrb[36].mxu0 %v2847_v2 }
  0xd8   :  { %613 = vmatprep.mubr.bf16.mxu0 %v2851_v3  ;;  %2635 = vmatmul.mubr.bf16.gmra.mrb[36].mxu1 %v2887_v4 }
  0xd9   :  { %2638 = vmatprep.mubr.bf16.mxu1 %v2890_v5 }
  0xdf   :  { %614 = vmatmul.mubr.bf16.gmra.mrb[40].mxu0 %v2853_v6 }
  0xe0   :  { %621 = vmatprep.mubr.bf16.mxu0 %v2857_v7  ;;  %2639 = vmatmul.mubr.bf16.gmra.mrb[40].mxu1 %v2891_v9 }
  0xe1   :  { %2642 = vmatprep.mubr.bf16.mxu1 %v2894_v12 }
  0xe7   :  { %622 = vmatmul.mubr.bf16.gmra.mrb[44].mxu0 %v2859_v10 }
  0xe8   :  { %2643 = vmatmul.mubr.bf16.gmra.mrb[44].mxu1 %v2895_v14 }
 0x162   :  { %v2430_v21 = vpop.f32.mrb[0].mxu0  ;;  %v2502_v24 = vpop.f32.mrb[0].mxu1 }
 0x163   :  { %v2431_v23 = vpop.f32.mrb[1].mxu0  ;;  %v2503_v27 = vpop.f32.mrb[1].mxu1 }
 0x164   :  { %v2432_v25 = vadd.f32 %v2431_v23, %v2430_v21  ;;  %v2433_v26 = vpop.f32.mrb[2].mxu0  ;;  %v3259_v29 = vadd.f32 %v2503_v27, %v2502_v24  ;;  %v2505_v30 = vpop.f32.mrb[2].mxu1 }
 0x165   :  { %v2434_v28 = vpop.f32.mrb[3].mxu0  ;;  %v2506_v32 = vpop.f32.mrb[3].mxu1 }
 0x166   :  { %v2435_v31 = vadd.f32 %v2434_v28, %v2433_v26  ;;  %v3261_v33 = vadd.f32 %v2506_v32, %v2505_v30 }
 0x168   :  { %v761_v34 = vpack.c.bf16 %v2435_v31, %v2432_v25  ;;  %v773_v35 = vpack.c.bf16 %v3261_v33, %v3259_v29  ;;  %v3298_v29 = vld [vmem:[%s3367_s5] ss:$0 sm:$0xff]  ;;  %s3104_s5 = smov [#allocation14]  }
 0x169   :  { %s1976_s13 = sshll.u32 %s3104_s5, 4  ;;  %s1977_s13 = int_to_ptr.vmem [resolvable:$true] %s1976_s13 }
 0x16a   :  { %v2436_v36 = vpop.f32.mrb[4].mxu0  ;;  %2662 = vmatprep.mubr.bf16.mxu1 %v761_v34  ;;  %v2508_v38 = vpop.f32.mrb[4].mxu1  ;;  %s3038_s14 = scalar_lea.vmem %s1977_s13, 2048  ;;  %p3043_p7 = scmp.lt.s32.totalorder %s1977_s13, %s1977_s13 }
 0x16b   :  { %v2437_v37 = vpop.f32.mrb[5].mxu0  ;;  %v2509_v41 = vpop.f32.mrb[5].mxu1  ;;  %p3039_p6 = scmp.ne.s32.totalorder %s1977_s13, %s3038_s14  ;;  %p3044_p8 = scmp.lt.s32.totalorder %s3038_s14, %s3038_s14 }
 0x16c   :  { %v2438_v39 = vadd.f32 %v2437_v37, %v2436_v36  ;;  %v2439_v40 = vpop.f32.mrb[6].mxu0  ;;  %v3265_v43 = vadd.f32 %v2509_v41, %v2508_v38  ;;  %v2511_v44 = vpop.f32.mrb[6].mxu1 }
 0x16d   :  { %v2440_v42 = vpop.f32.mrb[7].mxu0  ;;  %v2512_v46 = vpop.f32.mrb[7].mxu1  ;;  %p3045_p9 = por %p3044_p8, %p3043_p7 }
 0x16e   :  { %v2441_v45 = vadd.f32 %v2440_v42, %v2439_v40  ;;  %v3267_v47 = vadd.f32 %v2512_v46, %v2511_v44 }
 0x16f   :  { %p3046_p10 = pnand %p3045_p9, %p3039_p6 }
 0x170   :  { %v762_v48 = vpack.c.bf16 %v2441_v45, %v2438_v39  ;;  %v774_v49 = vpack.c.bf16 %v3267_v47, %v3265_v43 }
 0x172   :  { %v2442_v50 = vpop.f32.mrb[8].mxu0  ;;  %2663 = vmatmul.mubr.bf16.vlgmr.msra.gmra.mrb[16].mxu1 %v762_v48  ;;  %v2514_v52 = vpop.f32.mrb[8].mxu1 }
 0x173   :  { %v2443_v51 = vpop.f32.mrb[9].mxu0  ;;  %v2515_v55 = vpop.f32.mrb[9].mxu1 }
 0x174   :  { %v2444_v53 = vadd.f32 %v2443_v51, %v2442_v50  ;;  %v2445_v54 = vpop.f32.mrb[10].mxu0  ;;  %v3271_v57 = vadd.f32 %v2515_v55, %v2514_v52  ;;  %v2517_v58 = vpop.f32.mrb[10].mxu1 }
 0x175   :  { %v2446_v56 = vpop.f32.mrb[11].mxu0  ;;  %v2518_v60 = vpop.f32.mrb[11].mxu1 }
 0x176   :  { %v2447_v59 = vadd.f32 %v2446_v56, %v2445_v54  ;;  %v3273_v61 = vadd.f32 %v2518_v60, %v2517_v58 }
 0x178   :  { %v763_v62 = vpack.c.bf16 %v2447_v59, %v2444_v53  ;;  %v775_v63 = vpack.c.bf16 %v3273_v61, %v3271_v57 }
 0x17a   :  { %v2448_v0 = vpop.f32.mrb[12].mxu0  ;;  %2666 = vmatprep.mubr.bf16.mxu1 %v763_v62  ;;  %v2520_v2 = vpop.f32.mrb[12].mxu1 }
 0x17b   :  { %v2449_v1 = vpop.f32.mrb[13].mxu0  ;;  %v2521_v5 = vpop.f32.mrb[13].mxu1 }
 0x17c   :  { %v2450_v3 = vadd.f32 %v2449_v1, %v2448_v0  ;;  %v2451_v4 = vpop.f32.mrb[14].mxu0  ;;  %v3277_v7 = vadd.f32 %v2521_v5, %v2520_v2  ;;  %v2523_v8 = vpop.f32.mrb[14].mxu1 }
 0x17d   :  { %v2452_v6 = vpop.f32.mrb[15].mxu0  ;;  %v2524_v10 = vpop.f32.mrb[15].mxu1 }
 0x17e   :  { %v2453_v9 = vadd.f32 %v2452_v6, %v2451_v4  ;;  %v3279_v11 = vadd.f32 %v2524_v10, %v2523_v8 }
 0x180   :  { %v764_v12 = vpack.c.bf16 %v2453_v9, %v2450_v3  ;;  %v776_v13 = vpack.c.bf16 %v3279_v11, %v3277_v7 }
 0x182   :  { %v2454_v14 = vpop.f32.mrb[16].mxu0  ;;  %2667 = vmatmul.mubr.bf16.gmra.mrb[20].mxu1 %v764_v12 }
 0x183   :  { %v2455_v15 = vpop.f32.mrb[17].mxu0 }
 0x184   :  { %v2456_v16 = vadd.f32 %v2455_v15, %v2454_v14  ;;  %v2457_v17 = vpop.f32.mrb[18].mxu0 }
 0x185   :  { %v2458_v18 = vpop.f32.mrb[19].mxu0 }
 0x186   :  { %v2459_v19 = vadd.f32 %v2458_v18, %v2457_v17  ;;  %v2904_v18 = vld [vmem:[#allocation12 + $0x30] sm:$0xff]  }
 0x187   :  { %2706 = vmatprep.subr.bf16.mxu0 %v2904_v18 }
 0x188   :  { %v765_v20 = vpack.c.bf16 %v2459_v19, %v2456_v16  ;;  %2707 = vmatpush3.bf16.msra.mxu0 %v2904_v18  ;;  %v2905_v19 = vld [vmem:[#allocation12 + $0x38] sm:$0xff]  }
 0x189   :  { %2708 = vmatprep.subr.bf16.mxu0 %v2905_v19 }
 0x18a   :  { %v2460_v21 = vpop.f32.mrb[20].mxu0  ;;  %2670 = vmatprep.mubr.bf16.mxu1 %v765_v20 }
 0x18b   :  { %v2461_v22 = vpop.f32.mrb[21].mxu0 }
 0x18c   :  { %v2462_v23 = vadd.f32 %v2461_v22, %v2460_v21  ;;  %v2463_v24 = vpop.f32.mrb[22].mxu0  ;;  %2709 = vmatpush3.bf16.msra.mxu0 %v2905_v19 }
 0x18d   :  { %v2464_v25 = vpop.f32.mrb[23].mxu0 }
 0x18e   :  { %v2465_v26 = vadd.f32 %v2464_v25, %v2463_v24 }
 0x190   :  { %v766_v27 = vpack.c.bf16 %v2465_v26, %v2462_v23 }
 0x192   :  { %v2466_v28 = vpop.f32.mrb[24].mxu0  ;;  %2671 = vmatmul.mubr.bf16.gmra.mrb[24].mxu1 %v766_v27 }
 0x193   :  { %v2467_v30 = vpop.f32.mrb[25].mxu0 }
 0x194   :  { %v2468_v31 = vadd.f32 %v2467_v30, %v2466_v28  ;;  %v2469_v32 = vpop.f32.mrb[26].mxu0 }
 0x195   :  { %v2470_v34 = vpop.f32.mrb[27].mxu0 }
 0x196   :  { %v2471_v36 = vadd.f32 %v2470_v34, %v2469_v32 }
 0x198   :  { %v767_v37 = vpack.c.bf16 %v2471_v36, %v2468_v31 }
 0x19a   :  { %v2472_v38 = vpop.f32.mrb[28].mxu0  ;;  %2674 = vmatprep.mubr.bf16.mxu1 %v767_v37 }
 0x19b   :  { %v2473_v39 = vpop.f32.mrb[29].mxu0 }
 0x19c   :  { %v2474_v40 = vadd.f32 %v2473_v39, %v2472_v38  ;;  %v2475_v41 = vpop.f32.mrb[30].mxu0 }
 0x19d   :  { %v2476_v42 = vpop.f32.mrb[31].mxu0 }
 0x19e   :  { %v2477_v44 = vadd.f32 %v2476_v42, %v2475_v41 }
 0x1a0   :  { %v768_v45 = vpack.c.bf16 %v2477_v44, %v2474_v40 }
 0x1a2   :  { %v2478_v46 = vpop.f32.mrb[32].mxu0  ;;  %2675 = vmatmul.mubr.bf16.gmra.mrb[28].mxu1 %v768_v45 }
 0x1a3   :  { %v2479_v48 = vpop.f32.mrb[33].mxu0 }
 0x1a4   :  { %v2480_v50 = vadd.f32 %v2479_v48, %v2478_v46  ;;  %v2481_v51 = vpop.f32.mrb[34].mxu0 }
 0x1a5   :  { %v2482_v52 = vpop.f32.mrb[35].mxu0 }
 0x1a6   :  { %v2483_v53 = vadd.f32 %v2482_v52, %v2481_v51 }
 0x1a8   :  { %v769_v54 = vpack.c.bf16 %v2483_v53, %v2480_v50 }
 0x1aa   :  { %v2484_v55 = vpop.f32.mrb[36].mxu0  ;;  %2678 = vmatprep.mubr.bf16.mxu1 %v769_v54 }
 0x1ab   :  { %v2485_v56 = vpop.f32.mrb[37].mxu0 }
 0x1ac   :  { %v2486_v58 = vadd.f32 %v2485_v56, %v2484_v55  ;;  %v2487_v59 = vpop.f32.mrb[38].mxu0 }
 0x1ad   :  { %v2488_v60 = vpop.f32.mrb[39].mxu0 }
 0x1ae   :  { %v2489_v62 = vadd.f32 %v2488_v60, %v2487_v59 }
 0x1b0   :  { %v770_v0 = vpack.c.bf16 %v2489_v62, %v2486_v58 }
 0x1b2   :  { %v2490_v1 = vpop.f32.mrb[40].mxu0  ;;  %2679 = vmatmul.mubr.bf16.gmra.mrb[32].mxu1 %v770_v0 }
 0x1b3   :  { %v2491_v2 = vpop.f32.mrb[41].mxu0 }
 0x1b4   :  { %v2492_v3 = vadd.f32 %v2491_v2, %v2490_v1  ;;  %v2493_v4 = vpop.f32.mrb[42].mxu0 }
 0x1b5   :  { %v2494_v5 = vpop.f32.mrb[43].mxu0 }
 0x1b6   :  { %v2495_v6 = vadd.f32 %v2494_v5, %v2493_v4 }
 0x1b8   :  { %v771_v8 = vpack.c.bf16 %v2495_v6, %v2492_v3 }
 0x1ba   :  { %v2496_v9 = vpop.f32.mrb[44].mxu0  ;;  %2682 = vmatprep.mubr.bf16.mxu1 %v771_v8 }
 0x1bb   :  { %v2497_v10 = vpop.f32.mrb[45].mxu0 }
 0x1bc   :  { %v2498_v12 = vadd.f32 %v2497_v10, %v2496_v9  ;;  %v2499_v14 = vpop.f32.mrb[46].mxu0 }
 0x1bd   :  { %v2500_v15 = vpop.f32.mrb[47].mxu0 }
 0x1be   :  { %v2501_v16 = vadd.f32 %v2500_v15, %v2499_v14 }
 0x1c0   :  { %v772_v17 = vpack.c.bf16 %v2501_v16, %v2498_v12 }
 0x1c2   :  { %2683 = vmatmul.mubr.bf16.gmra.mrb[36].mxu1 %v772_v17 }
 0x1c3   :  { %2686 = vmatprep.mubr.bf16.mxu1 %v773_v35 }
 0x1ca   :  { %2687 = vmatmul.mubr.bf16.gmra.mrb[40].mxu1 %v774_v49 }
 0x1cb   :  { %2690 = vmatprep.mubr.bf16.mxu1 %v775_v63 }
 0x1d2   :  { %2691 = vmatmul.mubr.bf16.gmra.mrb[44].mxu1 %v776_v13 }
 0x245   :  { %v2664_v33 = vpop.f32.mrb[16].mxu1 }
 0x246   :  { %v1364_v35 = vadd.f32 %v2664_v33, %v3298_v29  ;;  %v1228_v43 = vpop.f32.mrb[17].mxu1 }
 0x247   :  { %v1362_v47 = vadd.f32 %v3298_v29, %v1228_v43  ;;  %v2665_v49 = vpop.f32.mrb[18].mxu1 }
 0x248   :  { %v1365_v57 = vadd.f32 %v2665_v49, %v3298_v29  ;;  %v1231_v61 = vpop.f32.mrb[19].mxu1  ;;  %v1396_v20 = vmax.f32 %v1364_v35, 0.0 }
 0x249   :  { %v1363_v63 = vadd.f32 %v3298_v29, %v1231_v61  ;;  %v1394_v11 = vmax.f32 %v1362_v47, 0.0 }
 0x24a   :  { %v1397_v7 = vmax.f32 %v1365_v57, 0.0 }
 0x24b   :  { %v1395_v13 = vmax.f32 %v1363_v63, 0.0 }
 0x24c   :  { %v1427_v21 = vpack.c.bf16 %v1397_v7, %v1396_v20 }
 0x24d   :  { %v1426_v22 = vpack.c.bf16 %v1395_v13, %v1394_v11 }
 0x24e   :  { %2384 = vst [vmem:[#allocation14 + $0x8] sm:$0xff] %v1427_v21  }
 0x24f   :  { %2228 = vst [vmem:[#allocation14] sm:$0xff] %v1426_v22   ;;  %2710 = vmatprep.mubr.bf16.mxu0 %v1426_v22 }
 0x250   :  { %2711 = vmatmul.mubr.bf16.vlgmr.msra.gmra.mrb[48].mxu0 %v1427_v21 }
 0x255   :  { %v2668_v23 = vpop.f32.mrb[20].mxu1 }
 0x256   :  { %v1368_v24 = vadd.f32 %v2668_v23, %v3298_v29  ;;  %v1244_v25 = vpop.f32.mrb[21].mxu1 }
 0x257   :  { %v1366_v26 = vadd.f32 %v3298_v29, %v1244_v25  ;;  %v2669_v27 = vpop.f32.mrb[22].mxu1 }
 0x258   :  { %v1369_v28 = vadd.f32 %v2669_v27, %v3298_v29  ;;  %v1247_v30 = vpop.f32.mrb[23].mxu1  ;;  %v1400_v32 = vmax.f32 %v1368_v24, 0.0 }
 0x259   :  { %v1367_v31 = vadd.f32 %v3298_v29, %v1247_v30  ;;  %v1398_v36 = vmax.f32 %v1366_v26, 0.0 }
 0x25a   :  { %v1401_v34 = vmax.f32 %v1369_v28, 0.0 }
 0x25b   :  { %v1399_v37 = vmax.f32 %v1367_v31, 0.0 }
 0x25c   :  { %v1429_v38 = vpack.c.bf16 %v1401_v34, %v1400_v32 }
 0x25d   :  { %v1428_v39 = vpack.c.bf16 %v1399_v37, %v1398_v36 }
 0x25e   :  { %2386 = vst [vmem:[#allocation14 + $0x18] sm:$0xff] %v1429_v38  }
 0x25f   :  { %2385 = vst [vmem:[#allocation14 + $0x10] sm:$0xff] %v1428_v39   ;;  %2714 = vmatprep.mubr.bf16.mxu0 %v1428_v39 }
 0x260   :  { %2715 = vmatmul.mubr.bf16.gmra.mrb[52].mxu0 %v1429_v38 }
 0x265   :  { %v2672_v40 = vpop.f32.mrb[24].mxu1 }
 0x266   :  { %v1372_v41 = vadd.f32 %v2672_v40, %v3298_v29  ;;  %v1260_v42 = vpop.f32.mrb[25].mxu1 }
 0x267   :  { %v1370_v44 = vadd.f32 %v3298_v29, %v1260_v42  ;;  %v2673_v45 = vpop.f32.mrb[26].mxu1 }
 0x268   :  { %v1373_v46 = vadd.f32 %v2673_v45, %v3298_v29  ;;  %v1263_v48 = vpop.f32.mrb[27].mxu1  ;;  %v1404_v51 = vmax.f32 %v1372_v41, 0.0 }
 0x269   :  { %v1371_v50 = vadd.f32 %v3298_v29, %v1263_v48  ;;  %v1402_v53 = vmax.f32 %v1370_v44, 0.0 }
 0x26a   :  { %v1405_v52 = vmax.f32 %v1373_v46, 0.0 }
 0x26b   :  { %v1403_v54 = vmax.f32 %v1371_v50, 0.0 }
 0x26c   :  { %v1431_v55 = vpack.c.bf16 %v1405_v52, %v1404_v51 }
 0x26d   :  { %v1430_v56 = vpack.c.bf16 %v1403_v54, %v1402_v53 }
 0x26e   :  { %2388 = vst [vmem:[#allocation14 + $0x28] sm:$0xff] %v1431_v55  }
 0x26f   :  { %2387 = vst [vmem:[#allocation14 + $0x20] sm:$0xff] %v1430_v56   ;;  %2718 = vmatprep.mubr.bf16.mxu0 %v1430_v56 }
 0x270   :  { %2719 = vmatmul.mubr.bf16.gmra.mrb[56].mxu0 %v1431_v55 }
 0x275   :  { %v2676_v58 = vpop.f32.mrb[28].mxu1 }
 0x276   :  { %v1376_v59 = vadd.f32 %v2676_v58, %v3298_v29  ;;  %v1276_v60 = vpop.f32.mrb[29].mxu1 }
 0x277   :  { %v1374_v62 = vadd.f32 %v3298_v29, %v1276_v60  ;;  %v2677_v0 = vpop.f32.mrb[30].mxu1 }
 0x278   :  { %v1377_v1 = vadd.f32 %v2677_v0, %v3298_v29  ;;  %v1279_v2 = vpop.f32.mrb[31].mxu1  ;;  %v1408_v4 = vmax.f32 %v1376_v59, 0.0 }
 0x279   :  { %v1375_v3 = vadd.f32 %v3298_v29, %v1279_v2  ;;  %v1406_v6 = vmax.f32 %v1374_v62, 0.0 }
 0x27a   :  { %v1409_v5 = vmax.f32 %v1377_v1, 0.0 }
 0x27b   :  { %v1407_v8 = vmax.f32 %v1375_v3, 0.0 }
 0x27c   :  { %v1433_v9 = vpack.c.bf16 %v1409_v5, %v1408_v4 }
 0x27d   :  { %v1432_v10 = vpack.c.bf16 %v1407_v8, %v1406_v6 }
 0x27e   :  { %2390 = vst [vmem:[#allocation14 + $0x38] sm:$0xff] %v1433_v9  }
 0x27f   :  { %2389 = vst [vmem:[#allocation14 + $0x30] sm:$0xff] %v1432_v10   ;;  %2722 = vmatprep.mubr.bf16.mxu0 %v1432_v10 }
 0x280   :  { %2723 = vmatmul.mubr.bf16.gmra.mrb[60].mxu0 %v1433_v9 }
 0x285   :  { %v2680_v12 = vpop.f32.mrb[32].mxu1 }
 0x286   :  { %v1380_v14 = vadd.f32 %v2680_v12, %v3298_v29  ;;  %v1292_v15 = vpop.f32.mrb[33].mxu1 }
 0x287   :  { %v1378_v16 = vadd.f32 %v3298_v29, %v1292_v15  ;;  %v2681_v17 = vpop.f32.mrb[34].mxu1 }
 0x288   :  { %v1381_v18 = vadd.f32 %v2681_v17, %v3298_v29  ;;  %v1295_v19 = vpop.f32.mrb[35].mxu1  ;;  %v1412_v35 = vmax.f32 %v1380_v14, 0.0 }
 0x289   :  { %v1379_v33 = vadd.f32 %v3298_v29, %v1295_v19  ;;  %v1410_v47 = vmax.f32 %v1378_v16, 0.0 }
 0x28a   :  { %v1413_v43 = vmax.f32 %v1381_v18, 0.0 }
 0x28b   :  { %v1411_v49 = vmax.f32 %v1379_v33, 0.0 }
 0x28c   :  { %v1435_v57 = vpack.c.bf16 %v1413_v43, %v1412_v35 }
 0x28d   :  { %v1434_v61 = vpack.c.bf16 %v1411_v49, %v1410_v47 }
 0x28e   :  { %2392 = vst [vmem:[#allocation14 + $0x48] sm:$0xff] %v1435_v57  }
 0x28f   :  { %2391 = vst [vmem:[#allocation14 + $0x40] sm:$0xff] %v1434_v61   ;;  %2726 = vmatprep.mubr.bf16.mxu0 %v1434_v61 }
 0x290   :  { %2727 = vmatmul.mubr.bf16.gmra.mrb[64].mxu0 %v1435_v57 }
 0x295   :  { %v2684_v63 = vpop.f32.mrb[36].mxu1 }
 0x296   :  { %v1384_v20 = vadd.f32 %v2684_v63, %v3298_v29  ;;  %v1308_v7 = vpop.f32.mrb[37].mxu1 }
 0x297   :  { %v1382_v11 = vadd.f32 %v3298_v29, %v1308_v7  ;;  %v2685_v13 = vpop.f32.mrb[38].mxu1 }
 0x298   :  { %v1385_v21 = vadd.f32 %v2685_v13, %v3298_v29  ;;  %v1311_v22 = vpop.f32.mrb[39].mxu1  ;;  %v1416_v24 = vmax.f32 %v1384_v20, 0.0 }
 0x299   :  { %v1383_v23 = vadd.f32 %v3298_v29, %v1311_v22  ;;  %v1414_v26 = vmax.f32 %v1382_v11, 0.0 }
 0x29a   :  { %v1417_v25 = vmax.f32 %v1385_v21, 0.0 }
 0x29b   :  { %v1415_v27 = vmax.f32 %v1383_v23, 0.0 }
 0x29c   :  { %v1437_v28 = vpack.c.bf16 %v1417_v25, %v1416_v24 }
 0x29d   :  { %v1436_v30 = vpack.c.bf16 %v1415_v27, %v1414_v26  ;;  %v2688_v31 = vpop.f32.mrb[40].mxu1 }
 0x29e   :  { %2394 = vst [vmem:[#allocation14 + $0x58] sm:$0xff] %v1437_v28   ;;  %v1388_v32 = vadd.f32 %v2688_v31, %v3298_v29  ;;  %v1324_v34 = vpop.f32.mrb[41].mxu1 }
 0x29f   :  { %2393 = vst [vmem:[#allocation14 + $0x50] sm:$0xff] %v1436_v30   ;;  %v1386_v36 = vadd.f32 %v3298_v29, %v1324_v34  ;;  %v2689_v37 = vpop.f32.mrb[42].mxu1  ;;  %2730 = vmatprep.mubr.bf16.mxu0 %v1436_v30 }
 0x2a0   :  { %v1389_v38 = vadd.f32 %v2689_v37, %v3298_v29  ;;  %v1327_v39 = vpop.f32.mrb[43].mxu1  ;;  %2731 = vmatmul.mubr.bf16.gmra.mrb[68].mxu0 %v1437_v28  ;;  %v1420_v41 = vmax.f32 %v1388_v32, 0.0 }
 0x2a1   :  { %v1387_v40 = vadd.f32 %v3298_v29, %v1327_v39  ;;  %v1418_v44 = vmax.f32 %v1386_v36, 0.0 }
 0x2a2   :  { %v1421_v42 = vmax.f32 %v1389_v38, 0.0 }
 0x2a3   :  { %v1419_v45 = vmax.f32 %v1387_v40, 0.0 }
 0x2a4   :  { %v1439_v46 = vpack.c.bf16 %v1421_v42, %v1420_v41 }
 0x2a5   :  { %v1438_v48 = vpack.c.bf16 %v1419_v45, %v1418_v44  ;;  %v2692_v50 = vpop.f32.mrb[44].mxu1 }
 0x2a6   :  { %2396 = vst [vmem:[#allocation14 + $0x68] sm:$0xff] %v1439_v46   ;;  %v1392_v51 = vadd.f32 %v2692_v50, %v3298_v29  ;;  %v1340_v52 = vpop.f32.mrb[45].mxu1 }
 0x2a7   :  { %2395 = vst [vmem:[#allocation14 + $0x60] sm:$0xff] %v1438_v48   ;;  %v1390_v53 = vadd.f32 %v3298_v29, %v1340_v52  ;;  %v2693_v54 = vpop.f32.mrb[46].mxu1  ;;  %2734 = vmatprep.mubr.bf16.mxu0 %v1438_v48 }
 0x2a8   :  { %v1393_v55 = vadd.f32 %v2693_v54, %v3298_v29  ;;  %v1343_v56 = vpop.f32.mrb[47].mxu1  ;;  %2735 = vmatmul.mubr.bf16.gmra.mrb[72].mxu0 %v1439_v46  ;;  %v1424_v59 = vmax.f32 %v1392_v51, 0.0 }
 0x2a9   :  { %v1391_v58 = vadd.f32 %v3298_v29, %v1343_v56  ;;  %v1422_v62 = vmax.f32 %v1390_v53, 0.0 }
 0x2aa   :  { %v1425_v60 = vmax.f32 %v1393_v55, 0.0 }
 0x2ab   :  { %v1423_v0 = vmax.f32 %v1391_v58, 0.0 }
 0x2ac   :  { %v1441_v1 = vpack.c.bf16 %v1425_v60, %v1424_v59 }
 0x2ad   :  { %v1440_v2 = vpack.c.bf16 %v1423_v0, %v1422_v62 }
 0x2ae   :  { %2398 = vst [vmem:[#allocation14 + $0x78] sm:$0xff] %v1441_v1  }
 0x2af   :  { %2397 = vst [vmem:[#allocation14 + $0x70] sm:$0xff] %v1440_v2   ;;  %2738 = vmatprep.mubr.bf16.mxu0 %v1440_v2 }
 0x2b0   :  { %2739 = vmatmul.mubr.bf16.gmra.mrb[76].mxu0 %v1441_v1 }
 0x2b1   :  { %3049 = shalt.err (!%p3046_p10)
}
 0x2b2   :  { %s3050_s19 = scalar_lea.hbm %s3369_s7, 2048 }
 0x2b3   :  { %p3051_p11 = scmp.ne.s32.totalorder %s3369_s7, %s3050_s19  ;;  %p3054_p12 = scmp.lt.u32.totalorder %s3050_s19, %s3369_s7 }
 0x2b5   :  { %p3056_p13 = pnand %p3054_p12, %p3051_p11 }
 0x2b7   :  { %3059 = shalt.err (!%p3056_p13)
}
 0x2b8   :  { %1982 = dma.vmem_to_hbm [thread:$0]  %s1977_s13, 2048, %s3369_s7, [#allocation5], %s3096_s17, %s3096_s17, %s3097_s18  }
 0x2b9   :  { %s3105_s7 = smov [#allocation15]  }
 0x2ba   :  { %s1988_s2 = sshll.u32 %s3105_s7, 4  ;;  %s1989_s2 = int_to_ptr.vmem [resolvable:$true] %s1988_s2 }
 0x2bb   :  { %s3060_s12 = scalar_lea.vmem %s1989_s2, 2048  ;;  %p3065_p1 = scmp.lt.s32.totalorder %s1989_s2, %s1989_s2 }
 0x2bc   :  { %p3061_p0 = scmp.ne.s32.totalorder %s1989_s2, %s3060_s12  ;;  %p3066_p2 = scmp.lt.s32.totalorder %s3060_s12, %s3060_s12 }
 0x2be   :  { %p3067_p3 = por %p3066_p2, %p3065_p1 }
 0x2c0   :  { %p3068_p4 = pnand %p3067_p3, %p3061_p0 }
 0x323   :  { %v2712_v29 = vpop.f32.mrb[48].mxu0 }
 0x324   :  { %v1684_v3 = vpop.f32.mrb[49].mxu0 }
 0x325   :  { %v2713_v4 = vpop.f32.mrb[50].mxu0 }
 0x326   :  { %v2312_v5 = vpack.c.bf16 %v2713_v4, %v2712_v29  ;;  %v1687_v6 = vpop.f32.mrb[51].mxu0 }
 0x327   :  { %v2307_v8 = vpack.c.bf16 %v1687_v6, %v1684_v3 }
 0x328   :  { %2399 = vst [vmem:[#allocation15 + $0x8] sm:$0xff] %v2312_v5  }
 0x329   :  { %2308 = vst [vmem:[#allocation15] sm:$0xff] %v2307_v8  }
 0x333   :  { %v2716_v9 = vpop.f32.mrb[52].mxu0 }
 0x334   :  { %v1700_v10 = vpop.f32.mrb[53].mxu0 }
 0x335   :  { %v2717_v12 = vpop.f32.mrb[54].mxu0 }
 0x336   :  { %v2322_v14 = vpack.c.bf16 %v2717_v12, %v2716_v9  ;;  %v1703_v15 = vpop.f32.mrb[55].mxu0 }
 0x337   :  { %v2317_v16 = vpack.c.bf16 %v1703_v15, %v1700_v10 }
 0x338   :  { %2401 = vst [vmem:[#allocation15 + $0x18] sm:$0xff] %v2322_v14  }
 0x339   :  { %2400 = vst [vmem:[#allocation15 + $0x10] sm:$0xff] %v2317_v16  }
 0x343   :  { %v2720_v17 = vpop.f32.mrb[56].mxu0 }
 0x344   :  { %v1716_v18 = vpop.f32.mrb[57].mxu0 }
 0x345   :  { %v2721_v19 = vpop.f32.mrb[58].mxu0 }
 0x346   :  { %v2332_v33 = vpack.c.bf16 %v2721_v19, %v2720_v17  ;;  %v1719_v35 = vpop.f32.mrb[59].mxu0 }
 0x347   :  { %v2327_v43 = vpack.c.bf16 %v1719_v35, %v1716_v18 }
 0x348   :  { %2403 = vst [vmem:[#allocation15 + $0x28] sm:$0xff] %v2332_v33  }
 0x349   :  { %2402 = vst [vmem:[#allocation15 + $0x20] sm:$0xff] %v2327_v43  }
 0x353   :  { %v2724_v47 = vpop.f32.mrb[60].mxu0 }
 0x354   :  { %v1732_v49 = vpop.f32.mrb[61].mxu0 }
 0x355   :  { %v2725_v57 = vpop.f32.mrb[62].mxu0 }
 0x356   :  { %v2342_v61 = vpack.c.bf16 %v2725_v57, %v2724_v47  ;;  %v1735_v63 = vpop.f32.mrb[63].mxu0 }
 0x357   :  { %v2337_v20 = vpack.c.bf16 %v1735_v63, %v1732_v49 }
 0x358   :  { %2405 = vst [vmem:[#allocation15 + $0x38] sm:$0xff] %v2342_v61  }
 0x359   :  { %2404 = vst [vmem:[#allocation15 + $0x30] sm:$0xff] %v2337_v20  }
 0x363   :  { %v2728_v7 = vpop.f32.mrb[64].mxu0 }
 0x364   :  { %v1748_v11 = vpop.f32.mrb[65].mxu0 }
 0x365   :  { %v2729_v13 = vpop.f32.mrb[66].mxu0 }
 0x366   :  { %v2352_v21 = vpack.c.bf16 %v2729_v13, %v2728_v7  ;;  %v1751_v22 = vpop.f32.mrb[67].mxu0 }
 0x367   :  { %v2347_v23 = vpack.c.bf16 %v1751_v22, %v1748_v11 }
 0x368   :  { %2407 = vst [vmem:[#allocation15 + $0x48] sm:$0xff] %v2352_v21  }
 0x369   :  { %2406 = vst [vmem:[#allocation15 + $0x40] sm:$0xff] %v2347_v23  }
 0x373   :  { %v2732_v24 = vpop.f32.mrb[68].mxu0 }
 0x374   :  { %v1764_v25 = vpop.f32.mrb[69].mxu0 }
 0x375   :  { %v2733_v26 = vpop.f32.mrb[70].mxu0 }
 0x376   :  { %v2362_v27 = vpack.c.bf16 %v2733_v26, %v2732_v24  ;;  %v1767_v28 = vpop.f32.mrb[71].mxu0 }
 0x377   :  { %v2357_v30 = vpack.c.bf16 %v1767_v28, %v1764_v25 }
 0x378   :  { %2409 = vst [vmem:[#allocation15 + $0x58] sm:$0xff] %v2362_v27  }
 0x379   :  { %2408 = vst [vmem:[#allocation15 + $0x50] sm:$0xff] %v2357_v30  }
 0x37b   :  { %v2736_v31 = vpop.f32.mrb[72].mxu0 }
 0x37c   :  { %v1780_v32 = vpop.f32.mrb[73].mxu0 }
 0x37d   :  { %v2737_v34 = vpop.f32.mrb[74].mxu0 }
 0x37e   :  { %v2372_v36 = vpack.c.bf16 %v2737_v34, %v2736_v31  ;;  %v1783_v37 = vpop.f32.mrb[75].mxu0 }
 0x37f   :  { %v2367_v38 = vpack.c.bf16 %v1783_v37, %v1780_v32 }
 0x380   :  { %2411 = vst [vmem:[#allocation15 + $0x68] sm:$0xff] %v2372_v36  }
 0x381   :  { %2410 = vst [vmem:[#allocation15 + $0x60] sm:$0xff] %v2367_v38  }
 0x383   :  { %v2740_v39 = vpop.f32.mrb[76].mxu0 }
 0x384   :  { %v1796_v40 = vpop.f32.mrb[77].mxu0 }
 0x385   :  { %v2741_v41 = vpop.f32.mrb[78].mxu0 }
 0x386   :  { %v2382_v42 = vpack.c.bf16 %v2741_v41, %v2740_v39  ;;  %v1799_v44 = vpop.f32.mrb[79].mxu0 }
 0x387   :  { %v2377_v45 = vpack.c.bf16 %v1799_v44, %v1796_v40 }
 0x388   :  { %2413 = vst [vmem:[#allocation15 + $0x78] sm:$0xff] %v2382_v42  }
 0x389   :  { %2412 = vst [vmem:[#allocation15 + $0x70] sm:$0xff] %v2377_v45  }
 0x38a   :  { %3071 = shalt.err (!%p3068_p4)
}
 0x38b   :  { %s3072_s26 = scalar_lea.hbm %s3370_s8, 2048 }
 0x38c   :  { %p3073_p5 = scmp.ne.s32.totalorder %s3370_s8, %s3072_s26  ;;  %p3076_p6 = scmp.lt.u32.totalorder %s3072_s26, %s3370_s8 }
 0x38e   :  { %p3078_p7 = pnand %p3076_p6, %p3073_p5 }
 0x390   :  { %3081 = shalt.err (!%p3078_p7)
}
 0x391   :  { %1994 = dma.vmem_to_hbm [thread:$0]  %s1989_s2, 2048, %s3370_s8, [#allocation16], %s3096_s17, %s3096_s17, %s3097_s18  }
 0x392   :  { %3090 = dma.done.wait [#allocation5], 2048  }
 0x393   :  { %3091 = vsyncadd [#allocation5], 4294965248 }
 0x394   :  { %3092 = dma.done.wait [#allocation16], 2048  }
 0x395   :  { %3093 = vsyncadd [#allocation16], 4294965248 }
 0x396   :  { %2001 = vsyncpa [#allocation4], 1 }
 0x397   :  { %2002 = vsyncpa [#allocation7], 1 }
 0x398   :  { %2003 = vsyncpa [#allocation10], 1 }
 0x399   :  { %2004 = vsyncpa [#allocation13], 1 }
 0x39a   :  { %2005 = vsyncpa [#allocation5], 1 }
 0x39b   :  { %2006 = vsyncpa [#allocation16], 1 }

</bundles_post_ra>
